<compile_context>
chip_gen: v7x
topology: tpu7x:2x2x1
jax: 0.10.0
libtpu: 0.0.40
codegen_flags: <defaults>
</compile_context>

<pallas_src>
import functools

import jax
import jax.numpy as jnp
from jax.experimental import pallas as pl
from jax.experimental.pallas import tpu as pltpu


def _jsd_kernel(p_ref, q_ref, out_ref, acc_ref, *,
                inv_total: float, total_rows: int, block_rows: int, steps: int):
    c = pl.program_id(0)   # (virtual) core axis — "parallel"
    i = pl.program_id(1)   # reduction axis within this core's chunk

    @pl.when(i == 0)
    def _init():
        acc_ref[...] = jnp.zeros_like(acc_ref)

    lp = p_ref[...].astype(jnp.float32)
    lq = q_ref[...].astype(jnp.float32)

    # Row-wise shifts. mx_m = 0.5*(mx_p + mx_q) >= max(0.5*(lp+lq)) per row, so it is
    # a valid overflow-safe logsumexp shift; saves one cross-lane max reduce (XLU).
    mx_p = jnp.max(lp, axis=-1, keepdims=True)
    mx_q = jnp.max(lq, axis=-1, keepdims=True)
    mx_m = 0.5 * (mx_p + mx_q)

    lse_p = mx_p + jnp.log(jnp.sum(jnp.exp(lp - mx_p), axis=-1, keepdims=True))
    lse_q = mx_q + jnp.log(jnp.sum(jnp.exp(lq - mx_q), axis=-1, keepdims=True))
    lm = 0.5 * (lp + lq)
    lse_m = mx_m + jnp.log(jnp.sum(jnp.exp(lm - mx_m), axis=-1, keepdims=True))

    # Per-row JS contribution, already summed over the class axis analytically.
    term = 0.5 * (lse_p + lse_q) - lse_m                      # (tb, 1)

    # Mask ragged-tail rows and duplicated (clamped) blocks by the NOMINAL global
    # row index. Select (jnp.where), never multiply, so garbage/Inf/NaN in the OOB
    # part of the VMEM window cannot reach the accumulator.
    row0 = (c * steps + i) * block_rows
    rows = row0 + jax.lax.broadcasted_iota(jnp.int32, term.shape, 0)
    term = jnp.where(rows < total_rows, term, 0.0)

    acc_ref[...] += jnp.sum(term, keepdims=True)              # (1,1) scalar accumulator

    @pl.when(i == pl.num_programs(1) - 1)
    def _finalize():
        # Broadcast this core's partial across its lane-dense output block;
        # the wrapper reads element [c, 0, 0] of each core's block.
        out_ref[...] = jnp.zeros(out_ref.shape, jnp.float32) + acc_ref[...] * inv_total


def js_div_loss_from_logits(logits_p: jax.Array, logits_q: jax.Array, *,
                            target_block_bytes: int = 4 << 20,
                            num_cores: int = 2,
                            cast_inputs_to_bf16: bool = False) -> jax.Array:
    assert logits_p.shape == logits_q.shape, "logits must have the same shape"
    if cast_inputs_to_bf16:
        # Optional: halves HBM traffic on strictly memory-bound chips (v5e/v6e).
        logits_p = logits_p.astype(jnp.bfloat16)
        logits_q = logits_q.astype(jnp.bfloat16)

    D = logits_p.shape[-1]
    p2 = logits_p.reshape(-1, D)
    q2 = logits_q.reshape(-1, D)
    B = p2.shape[0]
    inv_total = 1.0 / float(B * D)          # 'mean' reduction over original elements

    itemsize = p2.dtype.itemsize
    # Rows per block: aim for ~target_block_bytes of DMA per input per step (sized from
    # the actual itemsize), capped so the VMEM working set — 2 inputs x 2 pipeline
    # buffers (input dtype) + ~6 f32 block temporaries — stays inside a 36 MiB budget.
    vmem_budget = 36 * 1024 * 1024
    per_row_bytes = 4 * D * itemsize + 6 * D * 4
    tb = min(target_block_bytes // (D * itemsize), vmem_budget // per_row_bytes)
    tb = max(8, (tb // 8) * 8)
    if tb >= B:
        tb = B                               # one block covering all rows exactly

    n_blocks = pl.cdiv(B, tb)
    nc = max(1, min(num_cores, n_blocks))
    steps = pl.cdiv(n_blocks, nc)

    # Clamp so any extra (nc*steps - n_blocks) iterations re-read the last valid block
    # (never a fully-OOB DMA); the kernel masks those rows out via the nominal index.
    in_map = lambda c, i: (jnp.minimum(c * steps + i, n_blocks - 1), 0)

    partials = pl.pallas_call(
        functools.partial(_jsd_kernel, inv_total=inv_total, total_rows=B,
                          block_rows=tb, steps=steps),
        out_shape=jax.ShapeDtypeStruct((nc, 8, 128), jnp.float32),
        grid_spec=pltpu.PrefetchScalarGridSpec(
            num_scalar_prefetch=0,
            grid=(nc, steps),
            in_specs=[
                pl.BlockSpec((tb, D), in_map),
                pl.BlockSpec((tb, D), in_map),
            ],
            out_specs=pl.BlockSpec((1, 8, 128), lambda c, i: (c, 0, 0)),
            scratch_shapes=[pltpu.VMEM((1, 1), jnp.float32)],
        ),
        compiler_params=pltpu.CompilerParams(
            dimension_semantics=("parallel", "arbitrary"),
            vmem_limit_bytes=48 * 1024 * 1024,
        ),
    )(p2, q2)

    # One partial per (virtual) core; sum them.
    return jnp.sum(partials[:, 0, 0])


def _js_div_reference(logits_p, logits_q):
    lp32 = logits_p.astype(jnp.float32)
    lq32 = logits_q.astype(jnp.float32)
    p = jax.nn.log_softmax(lp32, axis=-1)
    q = jax.nn.log_softmax(lq32, axis=-1)
    m = jax.nn.log_softmax(0.5 * (lp32 + lq32), axis=-1)
    a = jnp.mean(jnp.exp(m) * (m - p))
    b = jnp.mean(jnp.exp(m) * (m - q))
    return 0.5 * (a + b)


if __name__ == "__main__":
    key = jax.random.PRNGKey(0)

    cases = []
    key, k1, k2 = jax.random.split(key, 3)
    cases.append((jax.random.normal(k1, (16, 128), jnp.float32),
                  jax.random.normal(k2, (16, 128), jnp.float32), {}))
    # Higher-rank input, D not a multiple of 128, row count not a multiple of 8
    # (ragged regression case — now handled without any jnp.pad).
    key, k1, k2 = jax.random.split(key, 3)
    cases.append((jax.random.normal(k1, (2, 3, 96), jnp.float32),
                  jax.random.normal(k2, (2, 3, 96), jnp.float32), {}))
    # bf16 pass-through (halves HBM traffic; kernel computes in f32).
    key, k1, k2 = jax.random.split(key, 3)
    cases.append((jax.random.normal(k1, (4, 8, 128), jnp.float32).astype(jnp.bfloat16),
                  jax.random.normal(k2, (4, 8, 128), jnp.float32).astype(jnp.bfloat16), {}))
    # Ragged tail + odd block count with tiny forced blocks: exercises the in-kernel
    # mask AND the clamped duplicate block on the 2-way core split.
    key, k1, k2 = jax.random.split(key, 3)
    cases.append((jax.random.normal(k1, (150, 64), jnp.float32),
                  jax.random.normal(k2, (150, 64), jnp.float32),
                  dict(target_block_bytes=8 * 64 * 4)))

    for lp, lq, kw in cases:
        loss = jax.block_until_ready(js_div_loss_from_logits(lp, lq, **kw))
        ref = _js_div_reference(lp, lq)
        assert jnp.allclose(loss, ref, atol=1e-5, rtol=1e-5), (lp.shape, loss, ref)

    print("KERNEL_OK")
</pallas_src>

<mosaic_0001>
module attributes {stable_mosaic.version = 11 : i64} {
  func.func @_jsd_kernel(%arg0: i32, %arg1: i32, %arg2: memref<16x128xf32, #tpu.memory_space<vmem>>, %arg3: memref<16x128xf32, #tpu.memory_space<vmem>>, %arg4: memref<1x8x128xf32, #tpu.memory_space<vmem>>, %arg5: memref<1x1xf32, #tpu.memory_space<vmem>>) attributes {dimension_semantics = [#tpu.dimension_semantics<parallel>, #tpu.dimension_semantics<arbitrary>], iteration_bounds = array<i64: 1, 1>, scalar_prefetch = 0 : i64, scratch_operands = 1 : i64, tpu.core_type = #tpu.core_type<tc>, window_params = [{transform_indices = @transform_0, window_bounds = array<i64: 16, 128>}, {transform_indices = @transform_1, window_bounds = array<i64: 16, 128>}, {transform_indices = @transform_2, window_bounds = array<i64: 1, 8, 128>}]} {
    %c0_i32 = arith.constant 0 : i32
    %0 = arith.cmpi eq, %arg1, %c0_i32 : i32
    %1 = arith.extui %0 : i1 to i32
    %c0_i32_0 = arith.constant 0 : i32
    %2 = arith.cmpi ne, %1, %c0_i32_0 : i32
    scf.if %2 {
      %cst_20 = arith.constant 0.000000e+00 : f32
      %61 = vector.broadcast %cst_20 : f32 to vector<1x1xf32>
      %c0_21 = arith.constant 0 : index
      %c0_22 = arith.constant 0 : index
      %62 = vector.load %arg5[%c0_21, %c0_22] : memref<1x1xf32, #tpu.memory_space<vmem>>, vector<1x1xf32>
      tpu.vector_store %arg5[%c0_21, %c0_22], %61 {strides = array<i32>} : memref<1x1xf32, #tpu.memory_space<vmem>>, vector<1x1xf32>,
    } else {
    }
    %c0 = arith.constant 0 : index
    %c0_1 = arith.constant 0 : index
    %3 = vector.load %arg2[%c0, %c0_1] : memref<16x128xf32, #tpu.memory_space<vmem>>, vector<16x128xf32>
    %c0_2 = arith.constant 0 : index
    %c0_3 = arith.constant 0 : index
    %4 = vector.load %arg3[%c0_2, %c0_3] : memref<16x128xf32, #tpu.memory_space<vmem>>, vector<16x128xf32>
    %cst = arith.constant dense<0xFF800000> : vector<16xf32>
    %5 = vector.multi_reduction <maximumf>, %3, %cst [1] : vector<16x128xf32> to vector<16xf32>
    %6 = vector.shape_cast %5 : vector<16xf32> to vector<16x1xf32>
    %cst_4 = arith.constant dense<0xFF800000> : vector<16xf32>
    %7 = vector.multi_reduction <maximumf>, %4, %cst_4 [1] : vector<16x128xf32> to vector<16xf32>
    %8 = vector.shape_cast %7 : vector<16xf32> to vector<16x1xf32>
    %9 = arith.addf %6, %8 : vector<16x1xf32>
    %cst_5 = arith.constant 5.000000e-01 : f32
    %10 = vector.broadcast %cst_5 : f32 to vector<16x1xf32>
    %11 = arith.mulf %10, %9 : vector<16x1xf32>
    %12 = vector.broadcast %6 : vector<16x1xf32> to vector<16x128xf32>
    %13 = arith.subf %3, %12 : vector<16x128xf32>
    %14 = math.exp %13 : vector<16x128xf32>
    %cst_6 = arith.constant dense<0.000000e+00> : vector<16xf32>
    %15 = vector.multi_reduction <add>, %14, %cst_6 [1] : vector<16x128xf32> to vector<16xf32>
    %16 = vector.shape_cast %15 : vector<16xf32> to vector<16x1xf32>
    %17 = math.log %16 : vector<16x1xf32>
    %18 = arith.addf %6, %17 : vector<16x1xf32>
    %19 = vector.broadcast %8 : vector<16x1xf32> to vector<16x128xf32>
    %20 = arith.subf %4, %19 : vector<16x128xf32>
    %21 = math.exp %20 : vector<16x128xf32>
    %cst_7 = arith.constant dense<0.000000e+00> : vector<16xf32>
    %22 = vector.multi_reduction <add>, %21, %cst_7 [1] : vector<16x128xf32> to vector<16xf32>
    %23 = vector.shape_cast %22 : vector<16xf32> to vector<16x1xf32>
    %24 = math.log %23 : vector<16x1xf32>
    %25 = arith.addf %8, %24 : vector<16x1xf32>
    %26 = arith.addf %3, %4 : vector<16x128xf32>
    %cst_8 = arith.constant 5.000000e-01 : f32
    %27 = vector.broadcast %cst_8 : f32 to vector<16x128xf32>
    %28 = arith.mulf %27, %26 : vector<16x128xf32>
    %29 = vector.broadcast %11 : vector<16x1xf32> to vector<16x128xf32>
    %30 = arith.subf %28, %29 : vector<16x128xf32>
    %31 = math.exp %30 : vector<16x128xf32>
    %cst_9 = arith.constant dense<0.000000e+00> : vector<16xf32>
    %32 = vector.multi_reduction <add>, %31, %cst_9 [1] : vector<16x128xf32> to vector<16xf32>
    %33 = vector.shape_cast %32 : vector<16xf32> to vector<16x1xf32>
    %34 = math.log %33 : vector<16x1xf32>
    %35 = arith.addf %11, %34 : vector<16x1xf32>
    %36 = arith.addf %18, %25 : vector<16x1xf32>
    %cst_10 = arith.constant 5.000000e-01 : f32
    %37 = vector.broadcast %cst_10 : f32 to vector<16x1xf32>
    %38 = arith.mulf %37, %36 : vector<16x1xf32>
    %39 = arith.subf %38, %35 : vector<16x1xf32>
    %c1_i32 = arith.constant 1 : i32
    %40 = arith.muli %arg0, %c1_i32 : i32
    %41 = arith.addi %40, %arg1 : i32
    %c16_i32 = arith.constant 16 : i32
    %42 = arith.muli %41, %c16_i32 : i32
    %43 = tpu.iota {dimensions = array<i32: 0>} : vector<16x1xi32>
    %44 = vector.broadcast %42 : i32 to vector<16x1xi32>
    %45 = arith.addi %44, %43 : vector<16x1xi32>
    %c16_i32_11 = arith.constant 16 : i32
    %46 = vector.broadcast %c16_i32_11 : i32 to vector<16x1xi32>
    %47 = arith.cmpi slt, %45, %46 : vector<16x1xi32>
    %cst_12 = arith.constant 0.000000e+00 : f32
    %48 = vector.broadcast %cst_12 : f32 to vector<16x1xf32>
    %49 = arith.select %47, %39, %48 : vector<16x1xi1>, vector<16x1xf32>
    %c0_13 = arith.constant 0 : index
    %c0_14 = arith.constant 0 : index
    %50 = vector.load %arg5[%c0_13, %c0_14] : memref<1x1xf32, #tpu.memory_space<vmem>>, vector<1x1xf32>
    %51 = vector.shape_cast %49 : vector<16x1xf32> to vector<1x16x1xf32>
    %cst_15 = arith.constant dense<0.000000e+00> : vector<1xf32>
    %52 = vector.multi_reduction <add>, %51, %cst_15 [1, 2] : vector<1x16x1xf32> to vector<1xf32>
    %53 = vector.shape_cast %52 : vector<1xf32> to vector<1x1x1xf32>
    %54 = vector.extract %53[0, 0, 0] : f32 from vector<1x1x1xf32>
    %55 = vector.broadcast %54 : f32 to vector<1x1xf32>
    %56 = arith.addf %50, %55 : vector<1x1xf32>
    %c0_16 = arith.constant 0 : index
    %c0_17 = arith.constant 0 : index
    %57 = vector.load %arg5[%c0_16, %c0_17] : memref<1x1xf32, #tpu.memory_space<vmem>>, vector<1x1xf32>
    tpu.vector_store %arg5[%c0_16, %c0_17], %56 {strides = array<i32>} : memref<1x1xf32, #tpu.memory_space<vmem>>, vector<1x1xf32>,
    %c0_i32_18 = arith.constant 0 : i32
    %58 = arith.cmpi eq, %arg1, %c0_i32_18 : i32
    %59 = arith.extui %58 : i1 to i32
    %c0_i32_19 = arith.constant 0 : i32
    %60 = arith.cmpi ne, %59, %c0_i32_19 : i32
    scf.if %60 {
      %cst_20 = arith.constant 0.000000e+00 : f32
      %61 = vector.broadcast %cst_20 : f32 to vector<1x8x128xf32>
      %c0_21 = arith.constant 0 : index
      %c0_22 = arith.constant 0 : index
      %62 = vector.load %arg5[%c0_21, %c0_22] : memref<1x1xf32, #tpu.memory_space<vmem>>, vector<1x1xf32>
      %cst_23 = arith.constant 4.8828125E-4 : f32
      %63 = vector.broadcast %cst_23 : f32 to vector<1x1xf32>
      %64 = arith.mulf %62, %63 : vector<1x1xf32>
      %65 = vector.shape_cast %64 : vector<1x1xf32> to vector<1x1x1xf32>
      %66 = vector.broadcast %65 : vector<1x1x1xf32> to vector<1x8x128xf32>
      %67 = arith.addf %61, %66 : vector<1x8x128xf32>
      %c0_24 = arith.constant 0 : index
      %c0_25 = arith.constant 0 : index
      %c0_26 = arith.constant 0 : index
      %68 = vector.load %arg4[%c0_24, %c0_25, %c0_26] : memref<1x8x128xf32, #tpu.memory_space<vmem>>, vector<1x8x128xf32>
      tpu.vector_store %arg4[%c0_24, %c0_25, %c0_26], %67 {strides = array<i32>} : memref<1x8x128xf32, #tpu.memory_space<vmem>>, vector<1x8x128xf32>,
    } else {
    }
    return
  }
  func.func @transform_0(%arg0: i32, %arg1: i32) -> (i32, i32) {
    %c1_i32 = arith.constant 1 : i32
    %0 = arith.muli %arg0, %c1_i32 : i32
    %1 = arith.addi %0, %arg1 : i32
    %c0_i32 = arith.constant 0 : i32
    %2 = arith.minsi %1, %c0_i32 : i32
    %c0_i32_0 = arith.constant 0 : i32
    %c0_i32_1 = arith.constant 0 : i32
    return %2, %c0_i32_0 : i32, i32
  }
  func.func @transform_1(%arg0: i32, %arg1: i32) -> (i32, i32) {
    %c1_i32 = arith.constant 1 : i32
    %0 = arith.muli %arg0, %c1_i32 : i32
    %1 = arith.addi %0, %arg1 : i32
    %c0_i32 = arith.constant 0 : i32
    %2 = arith.minsi %1, %c0_i32 : i32
    %c0_i32_0 = arith.constant 0 : i32
    %c0_i32_1 = arith.constant 0 : i32
    return %2, %c0_i32_0 : i32, i32
  }
  func.func @transform_2(%arg0: i32, %arg1: i32) -> (i32, i32, i32) {
    %c0_i32 = arith.constant 0 : i32
    %c0_i32_0 = arith.constant 0 : i32
    %c0_i32_1 = arith.constant 0 : i32
    return %arg0, %c0_i32, %c0_i32_0 : i32, i32, i32
  }
}

</mosaic_0001>

<bundles_post_ra>
// kernel: tpu_custom_call.1
= control target key start
LH: loop header
LB: loop body
LE: loop exit
PB: predicated region body
PF: predicated region fallthrough
CT: control target
= control target key end

     0   :  { %7 = vsyncpa [#allocation4], 0  ;;  %s373_s0 = inlined_call_operand.hbm [shape: f32[16,128], index: 0, kind: input, shape index: {}]   ;;  %s374_s1 = inlined_call_operand.hbm [shape: f32[16,128], index: 1, kind: input, shape index: {}]   ;;  %s375_s2 = inlined_call_operand.hbm [shape: f32[1,8,128], index: 2, kind: output, shape index: {}]  }
   0x1   :  { %8 = vsyncpa [#allocation7], 0 }
   0x2   :  { %9 = vsyncpa [#allocation5], 0  ;;  %s313_s9 = smov [#allocation3]   ;;  %s241_s13 = scalar_lea.hbm %s373_s0, 256 }
   0x3   :  { %s21_s10 = sshll.u32 %s313_s9, 4  ;;  %p242_p0 = scmp.ne.s32.totalorder %s373_s0, %s241_s13  ;;  %s22_s10 = int_to_ptr.vmem [resolvable:$true] %s21_s10 }
   0x4   :  { %p245_p1 = scmp.lt.u32.totalorder %s241_s13, %s373_s0 }
   0x6   :  { %p247_p2 = pnand %p245_p1, %p242_p0 }
   0x8   :  { %250 = shalt.err (!%p247_p2)
}
   0x9   :  { %s251_s18 = scalar_lea.vmem %s22_s10, 256  ;;  %p256_p4 = scmp.lt.s32.totalorder %s22_s10, %s22_s10 }
   0xa   :  { %p252_p3 = scmp.ne.s32.totalorder %s22_s10, %s251_s18  ;;  %p257_p5 = scmp.lt.s32.totalorder %s251_s18, %s251_s18 }
   0xc   :  { %p258_p6 = por %p257_p5, %p256_p4 }
   0xe   :  { %p259_p7 = pnand %p258_p6, %p252_p3 }
  0x10   :  { %262 = shalt.err (!%p259_p7)
}
  0x11   :  { %s314_s19 = smov 128   ;;  %s315_s20 = smov 8  }
  0x12   :  { %27 = dma.hbm_to_vmem [thread:$0]  %s373_s0, 256, %s22_s10, [#allocation4], %s314_s19, %s314_s19, %s315_s20  }
  0x13   :  { %s316_s23 = smov [#allocation6]   ;;  %s263_s27 = scalar_lea.hbm %s374_s1, 256 }
  0x14   :  { %s39_s24 = sshll.u32 %s316_s23, 4  ;;  %p264_p8 = scmp.ne.s32.totalorder %s374_s1, %s263_s27  ;;  %s40_s24 = int_to_ptr.vmem [resolvable:$true] %s39_s24 }
  0x15   :  { %p267_p9 = scmp.lt.u32.totalorder %s263_s27, %s374_s1 }
  0x17   :  { %p269_p10 = pnand %p267_p9, %p264_p8 }
  0x19   :  { %272 = shalt.err (!%p269_p10)
}
  0x1a   :  { %s273_s4 = scalar_lea.vmem %s40_s24, 256  ;;  %p278_p12 = scmp.lt.s32.totalorder %s40_s24, %s40_s24 }
  0x1b   :  { %p274_p11 = scmp.ne.s32.totalorder %s40_s24, %s273_s4  ;;  %p279_p13 = scmp.lt.s32.totalorder %s273_s4, %s273_s4 }
  0x1d   :  { %p280_p0 = por %p279_p13, %p278_p12 }
  0x1f   :  { %p281_p1 = pnand %p280_p0, %p274_p11 }
  0x21   :  { %284 = shalt.err (!%p281_p1)
}
  0x22   :  { %45 = dma.hbm_to_vmem [thread:$0]  %s374_s1, 256, %s40_s24, [#allocation7], %s314_s19, %s314_s19, %s315_s20  }
  0x23   :  { %307 = dma.done.wait [#allocation4], 256  }
  0x24   :  { %308 = vsyncadd [#allocation4], 4294967040 }
  0x25   :  { %309 = dma.done.wait [#allocation7], 256  }
  0x26   :  { %310 = vsyncadd [#allocation7], 4294967040  ;;  %v68_v0 = vld [vmem:[#allocation6] sm:$0xff]  ;;  %v66_v1 = vld [vmem:[#allocation3] sm:$0xff]  ;;  %vm153_vm0 = vcmask 7168   ;;  %vm64_vm1 = vcmask 0  }
  0x27   :  { %74 = vmax.xlane.f32.xlu1 %v68_v0  ;;  %70 = vmax.xlane.f32.xlu0 %v66_v1  ;;  %v69_v2 = vld [vmem:[#allocation6 + $0x8] sm:$0xff]  ;;  %v67_v3 = vld [vmem:[#allocation3 + $0x8] sm:$0xff]  ;;  %v114_v4 = vadd.f32 %v68_v0, %v66_v1  ;;  %s319_s6 = smov [#allocation8]  }
  0x28   :  { %v115_v11 = vadd.f32 %v69_v2, %v67_v3  ;;  %s192_s7 = sshll.u32 %s319_s6, 4  ;;  %s193_s7 = int_to_ptr.vmem [resolvable:$true] %s192_s7 }
  0x29   :  { %v116_v10 = vmul.f32 0.5, %v114_v4  ;;  %v318_v4 = vmov 0   ;;  %s285_s8 = scalar_lea.vmem %s193_s7, 128  ;;  %p290_p3 = scmp.lt.s32.totalorder %s193_s7, %s193_s7 }
  0x2a   :  { %v117_v21 = vmul.f32 0.5, %v115_v11  ;;  %215 = vset.pattern.permute.xlu1 %v318_v4  ;;  %216 = vset.pattern.permute.xlu0 %v318_v4  ;;  %p286_p2 = scmp.ne.s32.totalorder %s193_s7, %s285_s8  ;;  %p291_p4 = scmp.lt.s32.totalorder %s285_s8, %s285_s8 }
  0x2b   :  { %76 = vmax.xlane.f32.xlu1 %v69_v2  ;;  %72 = vmax.xlane.f32.xlu0 %v67_v3 }
  0x2c   :  { %p292_p5 = por %p291_p4, %p290_p3 }
  0x2e   :  { %p293_p6 = pnand %p292_p5, %p286_p2 }
  0xb4   :  { %v75_v5 = vpop.xlane.xlu1 %74  ;;  %v71_v6 = vpop.xlane.xlu0 %70 }
  0xb5   :  { %v98_v7 = vsub.f32 %v68_v0, %v75_v5  ;;  %v78_v8 = vadd.f32 %v75_v5, %v71_v6  ;;  %v82_v9 = vsub.f32 %v66_v1, %v71_v6 }
  0xb7   :  { %v80_v12 = vmul.f32 0.5, %v78_v8  ;;  %v84_v13 = vmul.f32 1.442695, %v82_v9  ;;  %v100_v14 = vmul.f32 1.442695, %v98_v7 }
  0xb8   :  { %v77_v15 = vpop.xlane.xlu1 %76  ;;  %v73_v16 = vpop.xlane.xlu0 %72 }
  0xb9   :  { %v99_v17 = vsub.f32 %v69_v2, %v77_v15  ;;  %v79_v18 = vadd.f32 %v77_v15, %v73_v16  ;;  %217 = vpow2.f32 %v84_v13  ;;  %v118_v19 = vsub.f32 %v116_v10, %v80_v12 }
  0xba   :  { %v83_v20 = vsub.f32 %v67_v3, %v73_v16  ;;  %219 = vpow2.f32 %v100_v14  ;;  %v317_v3 = vmov 0.0  }
  0xbb   :  { %v81_v22 = vmul.f32 0.5, %v79_v18  ;;  %v102_v24 = vmul.f32 1.442695, %v99_v17  ;;  %v120_v25 = vmul.f32 1.442695, %v118_v19 }
  0xbc   :  { %v86_v23 = vmul.f32 1.442695, %v83_v20  ;;  %65 = vst.msk [vmem:[#allocation2] sm:$0x1] %vm64_vm1, %v317_v3 }
  0xbd   :  { %v119_v26 = vsub.f32 %v117_v21, %v81_v22 }
  0xbe   :  { %221 = vpow2.f32 %v86_v23 }
  0xbf   :  { %223 = vpow2.f32 %v102_v24  ;;  %v122_v27 = vmul.f32 1.442695, %v119_v26 }
  0xc0   :  { %225 = vpow2.f32 %v120_v25 }
  0xc1   :  { %227 = vpow2.f32 %v122_v27 }
  0xc3   :  { %v218_v28 = vpop.eup %217 }
  0xc4   :  { %88 = vadd.xlane.f32.xlu0 %v218_v28  ;;  %v220_v29 = vpop.eup %219 }
  0xc8   :  { %v222_v30 = vpop.eup %221  ;;  %104 = vadd.xlane.f32.xlu0 %v220_v29 }
  0xc9   :  { %90 = vadd.xlane.f32.xlu1 %v222_v30  ;;  %v224_v31 = vpop.eup %223 }
  0xca   :  { %v226_v32 = vpop.eup %225 }
  0xcb   :  { %v228_v33 = vpop.eup %227 }
  0xcc   :  { %124 = vadd.xlane.f32.xlu0 %v226_v32 }
  0xcd   :  { %106 = vadd.xlane.f32.xlu1 %v224_v31 }
  0xd1   :  { %126 = vadd.xlane.f32.xlu1 %v228_v33 }
 0x151   :  { %v89_v34 = vpop.xlane.xlu0 %88 }
 0x152   :  { %229 = vlog2.f32 %v89_v34 }
 0x155   :  { %v105_v35 = vpop.xlane.xlu0 %104 }
 0x156   :  { %v91_v36 = vpop.xlane.xlu1 %90  ;;  %231 = vlog2.f32 %v105_v35 }
 0x157   :  { %233 = vlog2.f32 %v91_v36 }
 0x159   :  { %v125_v37 = vpop.xlane.xlu0 %124 }
 0x15a   :  { %v107_v38 = vpop.xlane.xlu1 %106  ;;  %235 = vlog2.f32 %v125_v37 }
 0x15b   :  { %237 = vlog2.f32 %v107_v38 }
 0x15c   :  { %v230_v39 = vpop.eup %229 }
 0x15d   :  { %v93_v41 = vmul.f32 0.6931472, %v230_v39 }
 0x15e   :  { %v127_v40 = vpop.xlane.xlu1 %126 }
 0x15f   :  { %239 = vlog2.f32 %v127_v40  ;;  %v96_v45 = vadd.f32 %v93_v41, %v71_v6 }
 0x160   :  { %v232_v42 = vpop.eup %231 }
 0x161   :  { %v234_v43 = vpop.eup %233  ;;  %v109_v44 = vmul.f32 0.6931472, %v232_v42 }
 0x162   :  { %v95_v48 = vmul.f32 0.6931472, %v234_v43 }
 0x163   :  { %v112_v46 = vadd.f32 %v109_v44, %v75_v5 }
 0x164   :  { %v236_v47 = vpop.eup %235  ;;  %v97_v53 = vadd.f32 %v95_v48, %v73_v16 }
 0x165   :  { %v238_v49 = vpop.eup %237  ;;  %v129_v50 = vmul.f32 0.6931472, %v236_v47  ;;  %v134_v51 = vadd.f32 %v112_v46, %v96_v45 }
 0x166   :  { %v111_v52 = vmul.f32 0.6931472, %v238_v49 }
 0x167   :  { %v132_v55 = vadd.f32 %v129_v50, %v80_v12  ;;  %v136_v56 = vmul.f32 0.5, %v134_v51  ;;  %v152_v12 = vld [vmem:[#allocation2] sm:$0x1] }
 0x168   :  { %v113_v54 = vadd.f32 %v111_v52, %v77_v15  ;;  %v176_v15 = vlaneseq }
 0x169   :  { %v240_v57 = vpop.eup %239  ;;  %v138_v62 = vsub.f32 %v136_v56, %v132_v55 }
 0x16a   :  { %v131_v58 = vmul.f32 0.6931472, %v240_v57  ;;  %v135_v59 = vadd.f32 %v113_v54, %v97_v53  ;;  %v177_v16 = vshrl.u32 %v176_v15, 7 }
 0x16b   :  { %v154_v0 = vsel %vm153_vm0, %v138_v62, 0.0 }
 0x16c   :  { %v133_v60 = vadd.f32 %v131_v58, %v81_v22  ;;  %v137_v61 = vmul.f32 0.5, %v135_v59  ;;  %v178_v17 = vsub.s32 0, %v177_v16 }
 0x16e   :  { %v139_v63 = vsub.f32 %v137_v61, %v133_v60 }
 0x170   :  { %v155_v1 = vsel %vm153_vm0, %v139_v63, 0.0 }
 0x171   :  { %v156_v2 = vadd.f32 %v155_v1, %v154_v0 }
 0x173   :  { %157 = vadd.xlane.f32.xlu0 %v156_v2 }
 0x200   :  { %v158_v5 = vpop.xlane.xlu0 %157 }
 0x201   :  { %v159_v6 = vrot.slane %v158_v5, 4 }
 0x203   :  { %v160_v7 = vadd.f32 %v159_v6, %v158_v5 }
 0x205   :  { %v161_v8 = vrot.slane %v160_v7, 2 }
 0x207   :  { %v162_v9 = vadd.f32 %v161_v8, %v160_v7 }
 0x209   :  { %v163_v10 = vrot.slane %v162_v9, 1 }
 0x20b   :  { %v164_v11 = vadd.f32 %v163_v10, %v162_v9 }
 0x20d   :  { %206 = vpush %v164_v11 }
 0x23e   :  { %s207_s1 = spop %206 }
 0x23f   :  { %v166_v13 = vstv %s207_s1 }
 0x240   :  { %v167_v14 = vadd.f32 %v166_v13, %v152_v12 }
 0x242   :  { %169 = vst.msk [vmem:[#allocation2] sm:$0x1] %vm64_vm1, %v167_v14 }
 0x249   :  { %v173_v18 = vld [vmem:[#allocation2] sm:$0x1] }
 0x24a   :  { %v174_v19 = vmul.f32 0.00048828125, %v173_v18 }
 0x24c   :  { %v179_v20 = vrot.slane %v174_v19, %v178_v17 }
 0x24e   :  { %181 = vperm.xlu1 %215, %v179_v20  }
 0x2cd   :  { %v182_v21 = vpop.permute.xlu1 %181 }
 0x2ce   :  { %185 = vst [vmem:[#allocation8] sm:$0xff] %v182_v21 }
 0x2cf   :  { %296 = shalt.err (!%p293_p6)
}
 0x2d0   :  { %s297_s11 = scalar_lea.hbm %s375_s2, 128 }
 0x2d1   :  { %p298_p7 = scmp.ne.s32.totalorder %s375_s2, %s297_s11  ;;  %p301_p8 = scmp.lt.u32.totalorder %s297_s11, %s375_s2 }
 0x2d3   :  { %p303_p9 = pnand %p301_p8, %p298_p7 }
 0x2d5   :  { %306 = shalt.err (!%p303_p9)
}
 0x2d6   :  { %195 = dma.vmem_to_hbm [thread:$0]  %s193_s7, 128, %s375_s2, [#allocation5]  }
 0x2d7   :  { %311 = dma.done.wait [#allocation5], 128  }
 0x2d8   :  { %312 = vsyncadd [#allocation5], 4294967168 }
 0x2d9   :  { %199 = vsyncpa [#allocation4], 1 }
 0x2da   :  { %200 = vsyncpa [#allocation7], 1 }
 0x2db   :  { %201 = vsyncpa [#allocation5], 1 }

</bundles_post_ra>
